<compile_context>
chip_gen: v7x
topology: tpu7x:2x2x1
jax: 0.10.0
libtpu: 0.0.40
codegen_flags: <defaults>
</compile_context>

<pallas_src>
import functools

import numpy as np
import jax
import jax.numpy as jnp
from jax import lax
from jax.experimental import pallas as pl
from jax.experimental.pallas import tpu as pltpu


def _round_up(v, m):
    return ((v + m - 1) // m) * m


# ---------------------------------------------------------------------------
# Stage 1: GCN extractor  H = relu(A_hat @ (X @ W))
# ---------------------------------------------------------------------------
def _gcn_kernel(a_ref, xw_ref, h_ref):
    k = pl.program_id(1)

    @pl.when(k == 0)
    def _init():
        h_ref[...] = jnp.zeros_like(h_ref)

    # bf16 x bf16 -> f32 accumulate, directly into the k-invariant output tile.
    h_ref[...] += jnp.dot(a_ref[...], xw_ref[...],
                          preferred_element_type=jnp.float32)

    @pl.when(k == pl.num_programs(1) - 1)
    def _finish():
        h_ref[...] = jnp.maximum(h_ref[...], 0.0)


def _gcn_tiles(n):
    n_pad = _round_up(max(n, 8), 8)
    if n_pad <= 512:
        # Small graph: a single (n_pad, n_pad) block, one reduction step.
        return n_pad, n_pad, n_pad
    # HBM-bound on the N^2 bf16 adjacency stream: 512-wide tiles hit ~85% of
    # the HBM roofline and amortize the ~0.35us per-grid-step overhead.
    # 512x512 bf16 = 512 KiB per buffer -> trivially within v7x's scoped VMEM.
    # n_pad // tm >= 2 whenever N > 512, so the "parallel" row axis spans both
    # TensorCores on v7x.
    tm, tk = 512, 512
    n_pad = _round_up(n_pad, 512)
    return n_pad, tm, tk


def _gcn_extractor(a_hat, x, w):
    n, _ = x.shape
    f_hid = w.shape[1]
    n_pad, tm, tk = _gcn_tiles(n)
    f_pad = _round_up(f_hid, 128)            # lane-dense output / accumulator

    xw = jnp.dot(x, w)                       # [n, f_hid] f32, computed once
    xw_p = jnp.zeros((n_pad, f_pad), jnp.bfloat16).at[:n, :f_hid].set(
        xw.astype(jnp.bfloat16))
    # TODO(synk): on v7x, A_hat could be cast to fp8 (keeping XW bf16, acc f32)
    # to halve the dominant HBM byte stream; kept bf16 here for portability.
    a_p = jnp.zeros((n_pad, n_pad), jnp.bfloat16).at[:n, :n].set(
        a_hat.astype(jnp.bfloat16))

    h = pl.pallas_call(
        _gcn_kernel,
        out_shape=jax.ShapeDtypeStruct((n_pad, f_pad), jnp.float32),
        grid=(n_pad // tm, n_pad // tk),
        in_specs=[pl.BlockSpec((tm, tk), lambda i, k: (i, k)),
                  pl.BlockSpec((tk, f_pad), lambda i, k: (k, 0))],
        out_specs=pl.BlockSpec((tm, f_pad), lambda i, k: (i, 0)),
        compiler_params=pltpu.CompilerParams(
            dimension_semantics=("parallel", "arbitrary"),
            vmem_limit_bytes=32 * 1024 * 1024),
    )(a_p, xw_p)
    return h[:n, :f_hid]


# ---------------------------------------------------------------------------
# Stage 2: per-edge cosine scores + mask (edges on the lane axis, bf16 inputs)
# ---------------------------------------------------------------------------
def _edge_scores_common(hs_ref, hd_ref):
    hs = hs_ref[...].astype(jnp.float32)      # [F_hid, te]
    hd = hd_ref[...].astype(jnp.float32)
    ip = jnp.sum(hs * hd, axis=0, keepdims=True)   # [1, te]
    ss = jnp.sum(hs * hs, axis=0, keepdims=True)
    sd = jnp.sum(hd * hd, axis=0, keepdims=True)
    # Matches torch: inner / (||hs|| * ||hd|| + 1e-8)
    return ip / (jnp.sqrt(ss) * jnp.sqrt(sd) + 1e-8)


def _edge_kernel_eval(hs_ref, hd_ref, out_ref):
    w = _edge_scores_common(hs_ref, hd_ref)
    m = (w > 0.0).astype(jnp.float32)
    out_ref[...] = jnp.concatenate([w, m], axis=0)     # [2, te]: weights | mask


def _edge_kernel_train(hs_ref, hd_ref, delta_ref, out_ref, *, inv_temp):
    w = _edge_scores_common(hs_ref, hd_ref)
    delta = delta_ref[...]
    logits = (jnp.log(delta) - jnp.log(1.0 - delta) + w) * inv_temp
    m = jax.nn.sigmoid(logits)
    out_ref[...] = jnp.concatenate([w, m], axis=0)


def _edge_tiles(e):
    e_pad = _round_up(max(e, 1), 128)
    te = min(e_pad, 2048)          # big lane-dense blocks amortize step cost
    e_pad = _round_up(e_pad, te)
    return e_pad, te


def _edge_scores(hs_p, hd_p, delta, *, te, training, temperature):
    f_hid, e_pad = hs_p.shape
    ep_spec = pl.BlockSpec((f_hid, te), lambda j: (0, j))
    out_spec = pl.BlockSpec((2, te), lambda j: (0, j))
    cparams = pltpu.CompilerParams(
        dimension_semantics=("parallel",),
        vmem_limit_bytes=32 * 1024 * 1024)

    if training:
        kernel = functools.partial(_edge_kernel_train,
                                   inv_temp=1.0 / float(temperature))
        out = pl.pallas_call(
            kernel,
            out_shape=jax.ShapeDtypeStruct((2, e_pad), jnp.float32),
            grid=(e_pad // te,),
            in_specs=[ep_spec, ep_spec,
                      pl.BlockSpec((1, te), lambda j: (0, j))],
            out_specs=out_spec,
            compiler_params=cparams,
        )(hs_p, hd_p, delta)
    else:
        # No delta input at all in eval -> no wasted (1, te) DMA per step.
        out = pl.pallas_call(
            _edge_kernel_eval,
            out_shape=jax.ShapeDtypeStruct((2, e_pad), jnp.float32),
            grid=(e_pad // te,),
            in_specs=[ep_spec, ep_spec],
            out_specs=out_spec,
            compiler_params=cparams,
        )(hs_p, hd_p)
    return out[0], out[1]           # edge_weights row, edge_mask row


# ---------------------------------------------------------------------------
# Wrapper
# ---------------------------------------------------------------------------
def _build_gcn_adjacency(edge_index, n):
    # TODO(synk): for large sparse graphs this dense [N, N] adjacency should be
    # replaced by CSR/COO neighbor lists + in-kernel segment-sum aggregation.
    src, dst = edge_index[0], edge_index[1]
    adj = jnp.zeros((n, n), jnp.float32).at[dst, src].add(1.0)
    diag = jnp.diagonal(adj)
    adj = adj + jnp.diag(jnp.where(diag > 0.0, 0.0, 1.0))   # add *remaining* self loops
    deg = jnp.sum(adj, axis=1)
    dinv = jnp.where(deg > 0.0, lax.rsqrt(deg), 0.0)
    return adj * dinv[:, None] * dinv[None, :]               # D^-1/2 (A+I) D^-1/2


def edge_masking_augmenter(x, edge_index, gcn_weight, *, temperature=1.0,
                           training=False, rng_key=None):
    """Returns (masked_edge_index, masked_edge_weights, edge_mask, edge_weights)."""
    n = x.shape[0]
    e = edge_index.shape[1]
    f_hid = gcn_weight.shape[1]
    src, dst = edge_index[0], edge_index[1]

    # --- GNN extractor (Pallas kernel 1) ------------------------------------
    a_hat = _build_gcn_adjacency(edge_index, n)
    h = _gcn_extractor(a_hat, x, gcn_weight)              # [n, f_hid] f32

    # --- endpoint gather, transposed so edges sit on the lane axis ----------
    # TODO(synk): the arbitrary-index row gather stays in the XLA wrapper; an
    # in-kernel scalar-prefetch gather is possible but unnecessary at this size.
    hs_t = h[src, :].T.astype(jnp.bfloat16)                # [f_hid, e]
    hd_t = h[dst, :].T.astype(jnp.bfloat16)

    e_pad, te = _edge_tiles(e)
    hs_p = jnp.zeros((f_hid, e_pad), jnp.bfloat16).at[:, :e].set(hs_t)
    hd_p = jnp.zeros((f_hid, e_pad), jnp.bfloat16).at[:, :e].set(hd_t)

    if training:
        key = rng_key if rng_key is not None else jax.random.PRNGKey(0)
        delta = jax.random.uniform(key, (1, e_pad), jnp.float32)
        delta = jnp.clip(delta, 1e-6, 1.0 - 1e-6)          # keep log() finite
    else:
        delta = None

    ew_p, em_p = _edge_scores(hs_p, hd_p, delta, te=te,
                              training=training, temperature=temperature)
    edge_weights = ew_p[:e]
    edge_mask = em_p[:e]

    # --- dynamic-shape boolean filtering (host-side glue) -------------------
    em_np = np.asarray(jax.device_get(edge_mask))
    keep = em_np > 0.5
    masked_edge_index = np.asarray(jax.device_get(edge_index))[:, keep]
    masked_edge_weights = em_np[keep]
    return masked_edge_index, masked_edge_weights, edge_mask, edge_weights


# ---------------------------------------------------------------------------
# Pure-JAX reference for the eval path (mirrors the bf16/f32 numerics)
# ---------------------------------------------------------------------------
def _reference_eval(x, edge_index, gcn_weight):
    n = x.shape[0]
    a = _build_gcn_adjacency(edge_index, n).astype(jnp.bfloat16)
    xw = jnp.dot(x, gcn_weight).astype(jnp.bfloat16)
    h = jnp.maximum(jnp.dot(a, xw, preferred_element_type=jnp.float32), 0.0)
    hs = h[edge_index[0]].astype(jnp.bfloat16).astype(jnp.float32)
    hd = h[edge_index[1]].astype(jnp.bfloat16).astype(jnp.float32)
    ip = jnp.sum(hs * hd, axis=1)
    ns = jnp.sqrt(jnp.sum(hs * hs, axis=1))
    nd = jnp.sqrt(jnp.sum(hd * hd, axis=1))
    ew = ip / (ns * nd + 1e-8)
    em = (ew > 0.0).astype(jnp.float32)
    return ew, em


if __name__ == "__main__":
    key = jax.random.PRNGKey(0)
    k_x, k_e, k_w, k_d = jax.random.split(key, 4)

    N, F_IN, F_HID, E = 16, 8, 32, 40

    x = jax.random.normal(k_x, (N, F_IN), dtype=jnp.float32)
    edge_index = jax.random.randint(k_e, (2, E), 0, N, dtype=jnp.int32)
    gcn_weight = jax.random.normal(k_w, (F_IN, F_HID), dtype=jnp.float32) * (
        1.0 / np.sqrt(F_IN))

    # Eval path (training=False): deterministic, check against pure-JAX reference.
    mei, mew, edge_mask, edge_weights = edge_masking_augmenter(
        x, edge_index, gcn_weight, temperature=1.0, training=False)
    jax.block_until_ready(edge_weights)

    ref_ew, _ = _reference_eval(x, edge_index, gcn_weight)
    np.testing.assert_allclose(np.asarray(edge_weights), np.asarray(ref_ew),
                               rtol=5e-3, atol=1e-4)
    np.testing.assert_array_equal(
        np.asarray(edge_mask),
        (np.asarray(edge_weights) > 0.0).astype(np.float32))
    assert mei.shape[0] == 2 and mei.shape[1] == mew.shape[0]

    # Training path (Gumbel-style sampling, delta ~ U(0,1) from jax.random).
    mei_t, mew_t, edge_mask_tr, ew_tr = edge_masking_augmenter(
        x, edge_index, gcn_weight, temperature=0.5, training=True, rng_key=k_d)
    jax.block_until_ready(edge_mask_tr)
    em_tr = np.asarray(edge_mask_tr)
    assert em_tr.shape == (E,)
    assert np.all(np.isfinite(em_tr)) and np.all((em_tr >= 0.0) & (em_tr <= 1.0))
    assert np.all(np.isfinite(np.asarray(ew_tr)))
    assert mei_t.shape[0] == 2 and mei_t.shape[1] == mew_t.shape[0]

    print("KERNEL_OK")
</pallas_src>

<mosaic_0001>
module attributes {stable_mosaic.version = 11 : i64} {
  func.func @_gcn_kernel(%arg0: i32, %arg1: i32, %arg2: memref<16x16xbf16, #tpu.memory_space<vmem>>, %arg3: memref<16x128xbf16, #tpu.memory_space<vmem>>, %arg4: memref<16x128xf32, #tpu.memory_space<vmem>>) attributes {dimension_semantics = [#tpu.dimension_semantics<parallel>, #tpu.dimension_semantics<arbitrary>], iteration_bounds = array<i64: 1, 1>, scalar_prefetch = 0 : i64, scratch_operands = 0 : i64, tpu.core_type = #tpu.core_type<tc>, window_params = [{transform_indices = @transform_0, window_bounds = array<i64: 16, 16>}, {transform_indices = @transform_1, window_bounds = array<i64: 16, 128>}, {transform_indices = @transform_2, window_bounds = array<i64: 16, 128>}]} {
    %c0_i32 = arith.constant 0 : i32
    %0 = arith.cmpi eq, %arg1, %c0_i32 : i32
    %1 = arith.extui %0 : i1 to i32
    %c0_i32_0 = arith.constant 0 : i32
    %2 = arith.cmpi ne, %1, %c0_i32_0 : i32
    scf.if %2 {
      %cst_10 = arith.constant 0.000000e+00 : f32
      %12 = vector.broadcast %cst_10 : f32 to vector<16x128xf32>
      %c0_11 = arith.constant 0 : index
      %c0_12 = arith.constant 0 : index
      %13 = vector.load %arg4[%c0_11, %c0_12] : memref<16x128xf32, #tpu.memory_space<vmem>>, vector<16x128xf32>
      tpu.vector_store %arg4[%c0_11, %c0_12], %12 {strides = array<i32>} : memref<16x128xf32, #tpu.memory_space<vmem>>, vector<16x128xf32>,
    } else {
    }
    %c0 = arith.constant 0 : index
    %c0_1 = arith.constant 0 : index
    %3 = vector.load %arg4[%c0, %c0_1] : memref<16x128xf32, #tpu.memory_space<vmem>>, vector<16x128xf32>
    %c0_2 = arith.constant 0 : index
    %c0_3 = arith.constant 0 : index
    %4 = vector.load %arg2[%c0_2, %c0_3] : memref<16x16xbf16, #tpu.memory_space<vmem>>, vector<16x16xbf16>
    %c0_4 = arith.constant 0 : index
    %c0_5 = arith.constant 0 : index
    %5 = vector.load %arg3[%c0_4, %c0_5] : memref<16x128xbf16, #tpu.memory_space<vmem>>, vector<16x128xbf16>
    %cst = arith.constant dense<0.000000e+00> : vector<16x128xf32>
    %6 = tpu.matmul %4, %5, %cst {dimension_numbers = #tpu.dot_dimension_numbers<[1], [0], [0], [1], [0, 0, 1, 1], [], []>} : vector<16x16xbf16>, vector<16x128xbf16>, vector<16x128xf32> -> vector<16x128xf32>
    %7 = arith.addf %3, %6 : vector<16x128xf32>
    %c0_6 = arith.constant 0 : index
    %c0_7 = arith.constant 0 : index
    %8 = vector.load %arg4[%c0_6, %c0_7] : memref<16x128xf32, #tpu.memory_space<vmem>>, vector<16x128xf32>
    tpu.vector_store %arg4[%c0_6, %c0_7], %7 {strides = array<i32>} : memref<16x128xf32, #tpu.memory_space<vmem>>, vector<16x128xf32>,
    %c0_i32_8 = arith.constant 0 : i32
    %9 = arith.cmpi eq, %arg1, %c0_i32_8 : i32
    %10 = arith.extui %9 : i1 to i32
    %c0_i32_9 = arith.constant 0 : i32
    %11 = arith.cmpi ne, %10, %c0_i32_9 : i32
    scf.if %11 {
      %c0_10 = arith.constant 0 : index
      %c0_11 = arith.constant 0 : index
      %12 = vector.load %arg4[%c0_10, %c0_11] : memref<16x128xf32, #tpu.memory_space<vmem>>, vector<16x128xf32>
      %cst_12 = arith.constant 0.000000e+00 : f32
      %13 = vector.broadcast %cst_12 : f32 to vector<16x128xf32>
      %14 = arith.maximumf %12, %13 : vector<16x128xf32>
      %c0_13 = arith.constant 0 : index
      %c0_14 = arith.constant 0 : index
      %15 = vector.load %arg4[%c0_13, %c0_14] : memref<16x128xf32, #tpu.memory_space<vmem>>, vector<16x128xf32>
      tpu.vector_store %arg4[%c0_13, %c0_14], %14 {strides = array<i32>} : memref<16x128xf32, #tpu.memory_space<vmem>>, vector<16x128xf32>,
    } else {
    }
    return
  }
  func.func @transform_0(%arg0: i32, %arg1: i32) -> (i32, i32) {
    %c0_i32 = arith.constant 0 : i32
    return %arg0, %arg1 : i32, i32
  }
  func.func @transform_1(%arg0: i32, %arg1: i32) -> (i32, i32) {
    %c0_i32 = arith.constant 0 : i32
    %c0_i32_0 = arith.constant 0 : i32
    return %arg1, %c0_i32 : i32, i32
  }
  func.func @transform_2(%arg0: i32, %arg1: i32) -> (i32, i32) {
    %c0_i32 = arith.constant 0 : i32
    %c0_i32_0 = arith.constant 0 : i32
    return %arg0, %c0_i32 : i32, i32
  }
}

</mosaic_0001>

<bundles_post_ra>
// kernel: tpu_custom_call.1
= control target key start
LH: loop header
LB: loop body
LE: loop exit
PB: predicated region body
PF: predicated region fallthrough
CT: control target
= control target key end

     0   :  { %7 = vsyncpa [#allocation3], 0  ;;  %s294_s0 = inlined_call_operand.hbm [shape: bf16[16,16], index: 0, kind: input, shape index: {}]   ;;  %s295_s1 = inlined_call_operand.hbm [shape: bf16[16,128], index: 1, kind: input, shape index: {}]   ;;  %s296_s2 = inlined_call_operand.hbm [shape: f32[16,128], index: 2, kind: output, shape index: {}]  }
   0x1   :  { %8 = vsyncpa [#allocation6], 0 }
   0x2   :  { %9 = vsyncpa [#allocation4], 0  ;;  %s234_s9 = smov [#allocation2]   ;;  %s162_s13 = scalar_lea.hbm %s294_s0, 128 }
   0x3   :  { %s15_s10 = sshll.u32 %s234_s9, 4  ;;  %p163_p0 = scmp.ne.s32.totalorder %s294_s0, %s162_s13  ;;  %s16_s10 = int_to_ptr.vmem [resolvable:$true] %s15_s10 }
   0x4   :  { %p166_p1 = scmp.lt.u32.totalorder %s162_s13, %s294_s0 }
   0x6   :  { %p168_p2 = pnand %p166_p1, %p163_p0 }
   0x8   :  { %171 = shalt.err (!%p168_p2)
}
   0x9   :  { %s172_s18 = scalar_lea.vmem %s16_s10, 128  ;;  %p177_p4 = scmp.lt.s32.totalorder %s16_s10, %s16_s10 }
   0xa   :  { %p173_p3 = scmp.ne.s32.totalorder %s16_s10, %s172_s18  ;;  %p178_p5 = scmp.lt.s32.totalorder %s172_s18, %s172_s18 }
   0xc   :  { %p179_p6 = por %p178_p5, %p177_p4 }
   0xe   :  { %p180_p7 = pnand %p179_p6, %p173_p3 }
  0x10   :  { %183 = shalt.err (!%p180_p7)
}
  0x11   :  { %s235_s19 = smov 64   ;;  %s236_s20 = smov 4  }
  0x12   :  { %21 = dma.hbm_to_vmem [thread:$0]  %s294_s0, 128, %s16_s10, [#allocation3], %s235_s19, %s235_s19, %s236_s20  }
  0x13   :  { %s237_s23 = smov [#allocation5]   ;;  %s184_s27 = scalar_lea.hbm %s295_s1, 128 }
  0x14   :  { %s27_s24 = sshll.u32 %s237_s23, 4  ;;  %p185_p8 = scmp.ne.s32.totalorder %s295_s1, %s184_s27  ;;  %s28_s24 = int_to_ptr.vmem [resolvable:$true] %s27_s24 }
  0x15   :  { %p188_p9 = scmp.lt.u32.totalorder %s184_s27, %s295_s1 }
  0x17   :  { %p190_p10 = pnand %p188_p9, %p185_p8 }
  0x19   :  { %193 = shalt.err (!%p190_p10)
}
  0x1a   :  { %s194_s4 = scalar_lea.vmem %s28_s24, 128  ;;  %p199_p12 = scmp.lt.s32.totalorder %s28_s24, %s28_s24 }
  0x1b   :  { %p195_p11 = scmp.ne.s32.totalorder %s28_s24, %s194_s4  ;;  %p200_p13 = scmp.lt.s32.totalorder %s194_s4, %s194_s4 }
  0x1d   :  { %p201_p0 = por %p200_p13, %p199_p12 }
  0x1f   :  { %p202_p1 = pnand %p201_p0, %p195_p11 }
  0x21   :  { %205 = shalt.err (!%p202_p1)
}
  0x22   :  { %33 = dma.hbm_to_vmem [thread:$0]  %s295_s1, 128, %s28_s24, [#allocation6], %s235_s19, %s235_s19, %s236_s20  }
  0x23   :  { %228 = dma.done.wait [#allocation3], 128  }
  0x24   :  { %229 = vsyncadd [#allocation3], 4294967168 }
  0x25   :  { %230 = dma.done.wait [#allocation6], 128  }
  0x26   :  { %231 = vsyncadd [#allocation6], 4294967168  ;;  %v238_v0 = vmov 0.0   ;;  %vm239_vm0 = vmmov 0   ;;  %v160_v1 = vld [vmem:[#allocation5] sm:$0xff]   ;;  %v161_v2 = vld [vmem:[#allocation2] sm:$0xff]  }
  0x27   :  { %145 = vmatprep.subr.bf16.mxu0 %v238_v0  ;;  %147 = vmatprep.mubr.msk.bf16.mxu0 %vm239_vm0, %v238_v0  ;;  %vm64_vm1 = vcmask 130048   ;;  %s240_s6 = smov [#allocation7]  }
  0x28   :  { %146 = vmatpush3.bf16.msra.mxu0 %v160_v1  ;;  %s127_s7 = sshll.u32 %s240_s6, 4  ;;  %s128_s7 = int_to_ptr.vmem [resolvable:$true] %s127_s7 }
  0x29   :  { %s206_s1 = scalar_lea.vmem %s128_s7, 256  ;;  %p211_p3 = scmp.lt.s32.totalorder %s128_s7, %s128_s7 }
  0x2a   :  { %p207_p2 = scmp.ne.s32.totalorder %s128_s7, %s206_s1  ;;  %p212_p4 = scmp.lt.s32.totalorder %s206_s1, %s206_s1 }
  0x2b   :  { %148 = vmatmul.mubr.msk.bf16.vlgmr.msra.gmra.mrb[0].mxu0 %vm64_vm1, %v161_v2 }
  0x2c   :  { %p213_p5 = por %p212_p4, %p211_p3 }
  0x2e   :  { %p214_p6 = pnand %p213_p5, %p207_p2 }
  0xfe   :  { %v102_v3 = vpop.f32.mrb[0].mxu0 }
  0xff   :  { %v149_v4 = vpop.f32.mrb[1].mxu0  ;;  %v118_v7 = vmax.f32 %v102_v3, 0.0 }
 0x100   :  { %v105_v5 = vpop.f32.mrb[2].mxu0 }
 0x101   :  { %v150_v6 = vpop.f32.mrb[3].mxu0  ;;  %v119_v8 = vmax.f32 %v105_v5, 0.0  ;;  %120 = vst [vmem:[#allocation7] sm:$0xff] %v118_v7 }
 0x103   :  { %121 = vst [vmem:[#allocation7 + $0x8] sm:$0xff] %v119_v8 }
 0x104   :  { %217 = shalt.err (!%p214_p6)
}
 0x105   :  { %s218_s10 = scalar_lea.hbm %s296_s2, 256 }
 0x106   :  { %p219_p7 = scmp.ne.s32.totalorder %s296_s2, %s218_s10  ;;  %p222_p8 = scmp.lt.u32.totalorder %s218_s10, %s296_s2 }
 0x108   :  { %p224_p9 = pnand %p222_p8, %p219_p7 }
 0x10a   :  { %227 = shalt.err (!%p224_p9)
}
 0x10b   :  { %s241_s15 = smov 128   ;;  %s242_s16 = smov 8  }
 0x10c   :  { %133 = dma.vmem_to_hbm [thread:$0]  %s128_s7, 256, %s296_s2, [#allocation4], %s241_s15, %s241_s15, %s242_s16  }
 0x10d   :  { %232 = dma.done.wait [#allocation4], 256  }
 0x10e   :  { %233 = vsyncadd [#allocation4], 4294967040 }
 0x10f   :  { %137 = vsyncpa [#allocation3], 1 }
 0x110   :  { %138 = vsyncpa [#allocation6], 1 }
 0x111   :  { %139 = vsyncpa [#allocation4], 1 }

</bundles_post_ra>
